<compile_context>
chip_gen: v6e
topology: v6e:2x2x1
jax: 0.10.0
libtpu: 0.0.40
codegen_flags: <defaults>
</compile_context>

<pallas_src>
import functools
import math

import jax
import jax.numpy as jnp
from jax.experimental import pallas as pl
from jax.experimental.pallas import tpu as pltpu


def make_pos_embedding(emb_size: int, maxlen: int = 201, dtype=jnp.float32):
    """Deterministic sinusoidal table, identical math to the PyTorch __init__."""
    den = jnp.exp(
        jnp.arange(0, emb_size, 2, dtype=jnp.float32) * (-math.log(10000.0) / emb_size)
    )
    pos = jnp.arange(0, maxlen, dtype=jnp.float32).reshape(maxlen, 1)
    pe = jnp.zeros((maxlen, emb_size), dtype=jnp.float32)
    pe = pe.at[:, 0::2].set(jnp.sin(pos * den))
    pe = pe.at[:, 1::2].set(jnp.cos(pos * den))
    return pe.astype(dtype)  # (maxlen, emb_size)


# ----------------------------- kernels ------------------------------------- #

def _pe_eval_kernel(x_ref, pos_ref, o_ref):
    # x_ref/pos_ref/o_ref: (tile_s, B*E) lane-dense 2-D blocks.
    o_ref[...] = (x_ref[...] + pos_ref[...]).astype(o_ref.dtype)


def _pe_train_kernel(x_ref, pos_ref, bits_ref, o_ref, *, dropout_p: float):
    # Inverted dropout applied in-kernel from pre-generated uint32 random bits.
    y = x_ref[...] + pos_ref[...]  # bf16 inputs promote to f32 (pos is f32)
    thresh = jnp.uint32(min(int(round(dropout_p * 2.0**32)), 2**32 - 1))
    keep = bits_ref[...] >= thresh            # keep with probability (1 - p)
    scale = jnp.float32(1.0 / (1.0 - dropout_p))
    o_ref[...] = jnp.where(keep, y * scale, jnp.zeros_like(y)).astype(o_ref.dtype)


# ----------------------------- wrapper -------------------------------------- #

def _dropout_bits(key, shape):
    return jax.random.bits(key, shape, dtype=jnp.uint32)


def _choose_tile_s(S: int, row_bytes: int, target_bytes: int = 2 << 20) -> int:
    """Pick a sequence tile giving ~2 MiB blocks (full array when it already fits)."""
    t = max(1, target_bytes // max(row_bytes, 1))
    if t >= S:
        return S                       # single block; block dims == full dims
    return max(8, (t // 8) * 8)        # keep second-to-last dim a multiple of 8


def positional_encoding(
    token_embedding,            # (S, B, E) sequence-first, like the torch module
    pos_table,                  # (maxlen, E) from make_pos_embedding
    *,
    dropout_p: float = 0.1,
    training: bool = False,
    rng_key=None,               # jax PRNG key for the dropout mask (training only)
):
    S, B, E = token_embedding.shape
    BE = B * E

    # Lane-dense 2-D views (free reshapes of contiguous row-major data).
    x2 = token_embedding.reshape(S, BE)
    # Pre-broadcast the positional table across batch once (tiny: S <= maxlen rows)
    # so the kernel is a pure lane-dense elementwise op.
    pos2 = jnp.tile(pos_table[:S].astype(jnp.float32), (1, B))  # (S, B*E)

    tile_s = _choose_tile_s(S, BE * 4)
    grid = (pl.cdiv(S, tile_s),)
    blk = pl.BlockSpec((tile_s, BE), lambda i: (i, 0))

    cparams = pltpu.CompilerParams(
        dimension_semantics=("parallel",),        # v7x: shard grid across both TCs
        vmem_limit_bytes=48 * 1024 * 1024,        # headroom for big tiles, < v7x 64 MiB
    )
    out_shape = jax.ShapeDtypeStruct((S, BE), token_embedding.dtype)

    use_dropout = training and dropout_p > 0.0
    if use_dropout:
        # TODO(synk): cannot reproduce torch nn.Dropout's RNG stream bit-exactly;
        # mask comes from jax.random (host-generated bits, thresholded in-kernel).
        if rng_key is None:
            rng_key = jax.random.PRNGKey(0)
        bits = _dropout_bits(rng_key, (S, BE))
        kernel = functools.partial(_pe_train_kernel, dropout_p=float(dropout_p))
        y2 = pl.pallas_call(
            kernel,
            out_shape=out_shape,
            grid=grid,
            in_specs=[blk, blk, blk],
            out_specs=blk,
            compiler_params=cparams,
        )(x2, pos2, bits)
    else:
        y2 = pl.pallas_call(
            _pe_eval_kernel,
            out_shape=out_shape,
            grid=grid,
            in_specs=[blk, blk],
            out_specs=blk,
            compiler_params=cparams,
        )(x2, pos2)

    return y2.reshape(S, B, E)


# ----------------------------- demo / checks -------------------------------- #

if __name__ == "__main__":
    key = jax.random.PRNGKey(0)

    # Small shapes consistent with the module: seq=8, batch=2, emb=32, maxlen=201.
    S, B, E = 8, 2, 32
    x = jax.random.normal(key, (S, B, E), dtype=jnp.float32)
    pos_table = make_pos_embedding(E, maxlen=201)

    # Eval-mode forward (dropout is identity) — exact check against pure JAX.
    y = positional_encoding(x, pos_table, dropout_p=0.1, training=False)
    y = jax.block_until_ready(y)
    ref = x + pos_table[:S].reshape(S, 1, E)
    assert y.shape == (S, B, E)
    assert jnp.allclose(y, ref, atol=1e-6, rtol=1e-6), "eval mismatch vs reference"

    # Training-mode forward (in-kernel inverted dropout) — check against the same mask.
    p = 0.1
    drop_key = jax.random.PRNGKey(1)
    y_tr = positional_encoding(x, pos_table, dropout_p=p, training=True, rng_key=drop_key)
    y_tr = jax.block_until_ready(y_tr)

    bits = _dropout_bits(drop_key, (S, B * E)).reshape(S, B, E)
    keep = bits >= jnp.uint32(min(int(round(p * 2.0**32)), 2**32 - 1))
    ref_tr = jnp.where(keep, ref * jnp.float32(1.0 / (1.0 - p)), 0.0)
    assert y_tr.shape == (S, B, E)
    assert jnp.allclose(y_tr, ref_tr, atol=1e-5, rtol=1e-5), "train mismatch vs reference"

    print("KERNEL_OK")
</pallas_src>

<mosaic_0001>
module attributes {stable_mosaic.version = 11 : i64} {
  func.func @_pe_eval_kernel(%arg0: i32, %arg1: memref<8x64xf32, #tpu.memory_space<vmem>>, %arg2: memref<8x64xf32, #tpu.memory_space<vmem>>, %arg3: memref<8x64xf32, #tpu.memory_space<vmem>>) attributes {dimension_semantics = [#tpu.dimension_semantics<parallel>], iteration_bounds = array<i64: 1>, scalar_prefetch = 0 : i64, scratch_operands = 0 : i64, tpu.core_type = #tpu.core_type<tc>, window_params = [{transform_indices = @transform_0, window_bounds = array<i64: 8, 64>}, {transform_indices = @transform_1, window_bounds = array<i64: 8, 64>}, {transform_indices = @transform_2, window_bounds = array<i64: 8, 64>}]} {
    %c0 = arith.constant 0 : index
    %c0_0 = arith.constant 0 : index
    %0 = vector.load %arg1[%c0, %c0_0] : memref<8x64xf32, #tpu.memory_space<vmem>>, vector<8x64xf32>
    %c0_1 = arith.constant 0 : index
    %c0_2 = arith.constant 0 : index
    %1 = vector.load %arg2[%c0_1, %c0_2] : memref<8x64xf32, #tpu.memory_space<vmem>>, vector<8x64xf32>
    %2 = arith.addf %0, %1 : vector<8x64xf32>
    %c0_3 = arith.constant 0 : index
    %c0_4 = arith.constant 0 : index
    %3 = vector.load %arg3[%c0_3, %c0_4] : memref<8x64xf32, #tpu.memory_space<vmem>>, vector<8x64xf32>
    tpu.vector_store %arg3[%c0_3, %c0_4], %2 {strides = array<i32>} : memref<8x64xf32, #tpu.memory_space<vmem>>, vector<8x64xf32>,
    return
  }
  func.func @transform_0(%arg0: i32) -> (i32, i32) {
    %c0_i32 = arith.constant 0 : i32
    %c0_i32_0 = arith.constant 0 : i32
    return %arg0, %c0_i32 : i32, i32
  }
  func.func @transform_1(%arg0: i32) -> (i32, i32) {
    %c0_i32 = arith.constant 0 : i32
    %c0_i32_0 = arith.constant 0 : i32
    return %arg0, %c0_i32 : i32, i32
  }
  func.func @transform_2(%arg0: i32) -> (i32, i32) {
    %c0_i32 = arith.constant 0 : i32
    %c0_i32_0 = arith.constant 0 : i32
    return %arg0, %c0_i32 : i32, i32
  }
}

</mosaic_0001>

<bundles_post_ra>
// kernel: tpu_custom_call.1
= control target key start
LH: loop header
LB: loop body
LE: loop exit
PB: predicated region body
PF: predicated region fallthrough
CT: control target
= control target key end

     0   :  { %7 = vsyncpa [#allocation3], 0  ;;  %s153_s0 = inlined_call_operand.hbm [shape: f32[8,64], index: 0, kind: input, shape index: {}]   ;;  %s154_s1 = inlined_call_operand.hbm [shape: f32[8,64], index: 1, kind: input, shape index: {}]   ;;  %s155_s2 = inlined_call_operand.hbm [shape: f32[8,64], index: 2, kind: output, shape index: {}]  }
   0x1   :  { %8 = vsyncpa [#allocation6], 0 }
   0x2   :  { %9 = vsyncpa [#allocation4], 0  ;;  %s126_s9 = smov [#allocation2]   ;;  %s127_s11 = smov [#allocation5]  }
   0x3   :  { %s16_s10 = sshll.u32 %s126_s9, 4  ;;  %s26_s12 = sshll.u32 %s127_s11, 4  ;;  %s17_s10 = int_to_ptr.vmem [resolvable:$true] %s16_s10  ;;  %s27_s12 = int_to_ptr.vmem [resolvable:$true] %s26_s12 }
   0x4   :  { %s68_s13 = scalar_lea.vmem %s17_s10, 128  ;;  %p73_p1 = scmp.lt.s32.totalorder %s17_s10, %s17_s10 }
   0x5   :  { %p69_p0 = scmp.ne.s32.totalorder %s17_s10, %s68_s13  ;;  %p74_p2 = scmp.lt.s32.totalorder %s68_s13, %s68_s13 }
   0x7   :  { %p75_p3 = por %p74_p2, %p73_p1 }
   0x9   :  { %p76_p4 = pnand %p75_p3, %p69_p0 }
   0xb   :  { %79 = shalt.err (!%p76_p4)
}
   0xc   :  { %19 = dma.hbm_to_vmem [thread:$0]  %s153_s0, 128, %s17_s10, [#allocation3]  }
   0xd   :  { %s88_s16 = scalar_lea.vmem %s27_s12, 128  ;;  %p93_p6 = scmp.lt.s32.totalorder %s27_s12, %s27_s12 }
   0xe   :  { %p89_p5 = scmp.ne.s32.totalorder %s27_s12, %s88_s16  ;;  %p94_p7 = scmp.lt.s32.totalorder %s88_s16, %s88_s16 }
  0x10   :  { %p95_p8 = por %p94_p7, %p93_p6 }
  0x12   :  { %p96_p9 = pnand %p95_p8, %p89_p5 }
  0x14   :  { %99 = shalt.err (!%p96_p9)
}
  0x15   :  { %29 = dma.hbm_to_vmem [thread:$0]  %s154_s1, 128, %s27_s12, [#allocation6]  }
  0x16   :  { %120 = dma.done.wait [#allocation3], 128  }
  0x17   :  { %121 = vsyncadd [#allocation3], 4294967168 }
  0x18   :  { %122 = dma.done.wait [#allocation6], 128  }
  0x19   :  { %123 = vsyncadd [#allocation6], 4294967168  ;;  %s128_s19 = smov [#allocation7]   ;;  %v36_v0 = vld [vmem:[#allocation2] sm:$0xff]  ;;  %v37_v1 = vld [vmem:[#allocation5] sm:$0xff]  ;;  %vm39_vm0 = vcmask 523264  }
  0x1a   :  { %s47_s20 = sshll.u32 %s128_s19, 4  ;;  %v38_v2 = vadd.f32 %v37_v1, %v36_v0  ;;  %s48_s20 = int_to_ptr.vmem [resolvable:$true] %s47_s20 }
  0x1b   :  { %s100_s0 = scalar_lea.vmem %s48_s20, 128  ;;  %p105_p11 = scmp.lt.s32.totalorder %s48_s20, %s48_s20 }
  0x1c   :  { %40 = vst.msk [vmem:[#allocation7] sm:$0xff] %vm39_vm0, %v38_v2  ;;  %p101_p10 = scmp.ne.s32.totalorder %s48_s20, %s100_s0  ;;  %p106_p12 = scmp.lt.s32.totalorder %s100_s0, %s100_s0 }
  0x1e   :  { %p107_p13 = por %p106_p12, %p105_p11 }
  0x20   :  { %p108_p0 = pnand %p107_p13, %p101_p10 }
  0x22   :  { %111 = shalt.err (!%p108_p0)
}
  0x23   :  { %50 = dma.vmem_to_hbm [thread:$0]  %s48_s20, 128, %s155_s2, [#allocation4]  }
  0x24   :  { %124 = dma.done.wait [#allocation4], 128  }
  0x25   :  { %125 = vsyncadd [#allocation4], 4294967168 }
  0x26   :  { %54 = vsyncpa [#allocation3], 1 }
  0x27   :  { %55 = vsyncpa [#allocation6], 1 }
  0x28   :  { %56 = vsyncpa [#allocation4], 1 }

</bundles_post_ra>
